<compile_context>
chip_gen: v7x
topology: tpu7x:2x2x1
jax: 0.10.0
libtpu: 0.0.40
codegen_flags: <defaults>
</compile_context>

<pallas_src>
import math

import jax
import jax.numpy as jnp
from jax.experimental import pallas as pl
from jax.experimental.pallas import tpu as pltpu

TEMPERATURE = 100.0
LOG_2PI = math.log(2.0 * math.pi)


def _round_up(x, m):
    return ((x + m - 1) // m) * m


def latent_potential_kernel(
    z_ref,      # [tb, D_LAT] f32   streamed per grid step
    w1_ref,     # [D_LAT, H] bf16   generator layer 1 (VMEM-resident)
    b1_ref,     # [1, H]     f32
    w23_ref,    # [H, H]     bf16   fused  W2 @ W3  (gen L2 + disc L1)
    b23_ref,    # [1, H]     f32    fused  b2 @ W3 + b3
    w4row_ref,  # [1, H]     f32    TEMPERATURE * discriminator layer-2 weight row
    const_ref,  # [1, 1]     f32    SMEM scalar: 0.5*D_LAT*log(2*pi) + TEMPERATURE*b4
    o_ref,      # [tb, 1]    f32
):
    z = z_ref[...]                               # f32, used exactly for the prior term
    zb = z.astype(jnp.bfloat16)

    # ---- generator L1 (+ReLU): bf16 MXU, f32 accumulate/epilogue ----
    h1 = jnp.dot(zb, w1_ref[...], preferred_element_type=jnp.float32) + b1_ref[...]
    h1 = jnp.maximum(h1, 0.0)

    # ---- fused generator-L2 @ discriminator-L1 (+ReLU) ----
    h2 = jnp.dot(h1.astype(jnp.bfloat16), w23_ref[...],
                 preferred_element_type=jnp.float32) + b23_ref[...]
    h2 = jnp.maximum(h2, 0.0)

    # ---- discriminator L2 (folded with temperature): VPU mul + XLU lane-reduce,
    #      no MXU push/pop for an N=1 result ----
    d_scaled = jnp.sum(h2 * w4row_ref[...], axis=-1, keepdims=True)   # [tb, 1]

    # ---- -log_prob(Z), variable part (exact f32; constant folded into const_ref) ----
    neg_logp_var = 0.5 * jnp.sum(z * z, axis=-1, keepdims=True)       # [tb, 1]

    # ---- epilogue: -logp + temperature * D(G(Z)) ----
    o_ref[...] = neg_logp_var + d_scaled + const_ref[0, 0]


def latent_potential(z, params, tile_b=4096):
    """z: [B, D_LAT] float32. Returns [B] float32."""
    w1, b1, w2, b2, w3, b3, w4, b4 = params
    B, d_lat = z.shape
    h = w1.shape[1]

    # ---- offline parameter prep (pure algebra, done once per call) ----
    w23 = w2 @ w3                                   # [H, H]  (no nonlinearity between)
    b23 = (b2 @ w3 + b3).astype(jnp.float32)        # [1, H]
    w1_bf = w1.astype(jnp.bfloat16)
    w23_bf = w23.astype(jnp.bfloat16)
    b1_f = b1.astype(jnp.float32)
    w4_row = (TEMPERATURE * w4).reshape(1, h).astype(jnp.float32)           # [1, H]
    const = (0.5 * d_lat * LOG_2PI + TEMPERATURE * b4).reshape(1, 1)
    const = const.astype(jnp.float32)                                        # [1, 1]

    # ---- batch tiling: even split, minimal padding, >=2 tiles for v7x megacore ----
    min_tiles = 2 if B >= 16 else 1
    n_tiles = max(min_tiles, pl.cdiv(B, tile_b))
    tb = _round_up(pl.cdiv(B, n_tiles), 8)          # sublane multiple
    n_tiles = pl.cdiv(B, tb)
    b_pad = n_tiles * tb
    if b_pad != B:
        z = jnp.pad(z, ((0, b_pad - B), (0, 0)))

    resident = lambda arr: pl.BlockSpec(arr.shape, lambda i: (0, 0))  # VMEM-resident

    # Cost hint (post W23-fusion, bf16 weights).
    flops = 2.0 * b_pad * (d_lat * h + h * h + h + d_lat) + 6.0 * b_pad * h
    bytes_accessed = (
        4.0 * b_pad * d_lat                 # z stream (f32)
        + 2.0 * (d_lat * h + h * h)         # bf16 weights
        + 4.0 * (3 * h + 1)                 # f32 biases, w4 row, const
        + 4.0 * b_pad                       # output
    )

    out = pl.pallas_call(
        latent_potential_kernel,
        out_shape=jax.ShapeDtypeStruct((b_pad, 1), jnp.float32),
        grid=(n_tiles,),
        in_specs=[
            pl.BlockSpec((tb, d_lat), lambda i: (i, 0)),          # streamed z tile
            resident(w1_bf), resident(b1_f),
            resident(w23_bf), resident(b23),
            resident(w4_row),
            pl.BlockSpec(memory_space=pltpu.MemorySpace.SMEM),    # (1,1) scalar const
        ],
        out_specs=pl.BlockSpec((tb, 1), lambda i: (i, 0)),
        compiler_params=pltpu.CompilerParams(
            dimension_semantics=("parallel",),
            vmem_limit_bytes=(64 * 1024 * 1024 if tb > 4096 else None),
        ),
        cost_estimate=pl.CostEstimate(
            flops=int(flops), transcendentals=0,
            bytes_accessed=int(bytes_accessed)),
    )(z, w1_bf, b1_f, w23_bf, b23, w4_row, const)

    return out[:B, 0]   # discriminator squeezes its last dim -> per-sample scalar


def init_params(key, d_lat, h, d_x):
    ks = jax.random.split(key, 8)
    scale = 0.05
    w1 = scale * jax.random.normal(ks[0], (d_lat, h), jnp.float32)
    b1 = scale * jax.random.normal(ks[1], (1, h), jnp.float32)
    w2 = scale * jax.random.normal(ks[2], (h, d_x), jnp.float32)
    b2 = scale * jax.random.normal(ks[3], (1, d_x), jnp.float32)
    w3 = scale * jax.random.normal(ks[4], (d_x, h), jnp.float32)
    b3 = scale * jax.random.normal(ks[5], (1, h), jnp.float32)
    w4 = scale * jax.random.normal(ks[6], (h, 1), jnp.float32)
    b4 = scale * jax.random.normal(ks[7], (1, 1), jnp.float32)
    return (w1, b1, w2, b2, w3, b3, w4, b4)


def reference(z, params):
    """Pure-JAX f32 reference of the original (unfused) forward pass."""
    w1, b1, w2, b2, w3, b3, w4, b4 = params
    h1 = jnp.maximum(z @ w1 + b1, 0.0)
    g = h1 @ w2 + b2
    h2 = jnp.maximum(g @ w3 + b3, 0.0)
    d = (h2 @ w4 + b4)[:, 0]
    logp = -0.5 * jnp.sum(z * z, axis=-1) - 0.5 * z.shape[-1] * LOG_2PI
    return -logp + TEMPERATURE * d


def reference_bf16(z, params):
    """Reference that mirrors the kernel's bf16 weight/activation rounding."""
    w1, b1, w2, b2, w3, b3, w4, b4 = params
    w23 = (w2 @ w3).astype(jnp.bfloat16)
    b23 = b2 @ w3 + b3
    h1 = jnp.maximum(
        jnp.dot(z.astype(jnp.bfloat16), w1.astype(jnp.bfloat16),
                preferred_element_type=jnp.float32) + b1, 0.0)
    h2 = jnp.maximum(
        jnp.dot(h1.astype(jnp.bfloat16), w23,
                preferred_element_type=jnp.float32) + b23, 0.0)
    d = jnp.sum(h2 * (TEMPERATURE * w4).reshape(1, -1), axis=-1) + TEMPERATURE * b4[0, 0]
    return 0.5 * jnp.sum(z * z, axis=-1) + 0.5 * z.shape[-1] * LOG_2PI + d


if __name__ == "__main__":
    D_LAT, H, D_X = 32, 64, 64
    key = jax.random.PRNGKey(0)
    k_z, k_p, k_z2 = jax.random.split(key, 3)
    params = init_params(k_p, D_LAT, H, D_X)

    # Single-tile path.
    B = 8
    z = jax.random.normal(k_z, (B, D_LAT), jnp.float32)
    out = jax.block_until_ready(latent_potential(z, params))
    assert out.shape == (B,)
    # Tight check vs. a reference with the same bf16 rounding (kernel fidelity).
    assert jnp.allclose(out, reference_bf16(z, params), atol=5e-2, rtol=1e-3)
    # Loose check vs. the exact f32 torch-equivalent forward (bf16 weights + x100
    # temperature reassociate/round; see review correctness notes).
    assert jnp.allclose(out, reference(z, params), atol=1.0, rtol=2e-2)

    # Multi-tile + padding + >=2-tile (megacore) path: B=20, tile_b=8 -> 3 tiles, pad 24.
    B2 = 20
    z2 = jax.random.normal(k_z2, (B2, D_LAT), jnp.float32)
    out2 = jax.block_until_ready(latent_potential(z2, params, tile_b=8))
    assert out2.shape == (B2,)
    assert jnp.allclose(out2, reference_bf16(z2, params), atol=5e-2, rtol=1e-3)
    assert jnp.allclose(out2, reference(z2, params), atol=1.0, rtol=2e-2)

    print("KERNEL_OK")
</pallas_src>

<mosaic_0001>
module attributes {stable_mosaic.version = 11 : i64} {
  func.func @latent_potential_kernel(%arg0: i32, %arg1: memref<8x32xf32, #tpu.memory_space<vmem>>, %arg2: memref<32x64xbf16, #tpu.memory_space<vmem>>, %arg3: memref<1x64xf32, #tpu.memory_space<vmem>>, %arg4: memref<64x64xbf16, #tpu.memory_space<vmem>>, %arg5: memref<1x64xf32, #tpu.memory_space<vmem>>, %arg6: memref<1x64xf32, #tpu.memory_space<vmem>>, %arg7: memref<1x1xf32, #tpu.memory_space<smem>>, %arg8: memref<8x1xf32, #tpu.memory_space<vmem>>) attributes {dimension_semantics = [#tpu.dimension_semantics<parallel>], iteration_bounds = array<i64: 1>, scalar_prefetch = 0 : i64, scratch_operands = 0 : i64, tpu.core_type = #tpu.core_type<tc>, window_params = [{transform_indices = @transform_0, window_bounds = array<i64: 8, 32>}, {pipeline_mode = #tpu.pipeline_mode<synchronous>, transform_indices = @transform_1, window_bounds = array<i64: 32, 64>}, {pipeline_mode = #tpu.pipeline_mode<synchronous>, transform_indices = @transform_2, window_bounds = array<i64: 1, 64>}, {pipeline_mode = #tpu.pipeline_mode<synchronous>, transform_indices = @transform_3, window_bounds = array<i64: 64, 64>}, {pipeline_mode = #tpu.pipeline_mode<synchronous>, transform_indices = @transform_4, window_bounds = array<i64: 1, 64>}, {pipeline_mode = #tpu.pipeline_mode<synchronous>, transform_indices = @transform_5, window_bounds = array<i64: 1, 64>}, {transform_indices = @transform_6, window_bounds = array<i64: 1, 1>}, {transform_indices = @transform_7, window_bounds = array<i64: 8, 1>}]} {
    %c0 = arith.constant 0 : index
    %c0_0 = arith.constant 0 : index
    %0 = vector.load %arg1[%c0, %c0_0] : memref<8x32xf32, #tpu.memory_space<vmem>>, vector<8x32xf32>
    %1 = arith.truncf %0 : vector<8x32xf32> to vector<8x32xbf16>
    %c0_1 = arith.constant 0 : index
    %c0_2 = arith.constant 0 : index
    %2 = vector.load %arg2[%c0_1, %c0_2] : memref<32x64xbf16, #tpu.memory_space<vmem>>, vector<32x64xbf16>
    %cst = arith.constant dense<0.000000e+00> : vector<8x64xf32>
    %3 = tpu.matmul %1, %2, %cst {dimension_numbers = #tpu.dot_dimension_numbers<[1], [0], [0], [1], [0, 0, 1, 1], [], []>} : vector<8x32xbf16>, vector<32x64xbf16>, vector<8x64xf32> -> vector<8x64xf32>
    %c0_3 = arith.constant 0 : index
    %c0_4 = arith.constant 0 : index
    %4 = vector.load %arg3[%c0_3, %c0_4] : memref<1x64xf32, #tpu.memory_space<vmem>>, vector<1x64xf32>
    %5 = vector.broadcast %4 : vector<1x64xf32> to vector<8x64xf32>
    %6 = arith.addf %3, %5 : vector<8x64xf32>
    %cst_5 = arith.constant 0.000000e+00 : f32
    %7 = vector.broadcast %cst_5 : f32 to vector<8x64xf32>
    %8 = arith.maximumf %6, %7 : vector<8x64xf32>
    %9 = arith.truncf %8 : vector<8x64xf32> to vector<8x64xbf16>
    %c0_6 = arith.constant 0 : index
    %c0_7 = arith.constant 0 : index
    %10 = vector.load %arg4[%c0_6, %c0_7] : memref<64x64xbf16, #tpu.memory_space<vmem>>, vector<64x64xbf16>
    %cst_8 = arith.constant dense<0.000000e+00> : vector<8x64xf32>
    %11 = tpu.matmul %9, %10, %cst_8 {dimension_numbers = #tpu.dot_dimension_numbers<[1], [0], [0], [1], [0, 0, 1, 1], [], []>} : vector<8x64xbf16>, vector<64x64xbf16>, vector<8x64xf32> -> vector<8x64xf32>
    %c0_9 = arith.constant 0 : index
    %c0_10 = arith.constant 0 : index
    %12 = vector.load %arg5[%c0_9, %c0_10] : memref<1x64xf32, #tpu.memory_space<vmem>>, vector<1x64xf32>
    %13 = vector.broadcast %12 : vector<1x64xf32> to vector<8x64xf32>
    %14 = arith.addf %11, %13 : vector<8x64xf32>
    %cst_11 = arith.constant 0.000000e+00 : f32
    %15 = vector.broadcast %cst_11 : f32 to vector<8x64xf32>
    %16 = arith.maximumf %14, %15 : vector<8x64xf32>
    %c0_12 = arith.constant 0 : index
    %c0_13 = arith.constant 0 : index
    %17 = vector.load %arg6[%c0_12, %c0_13] : memref<1x64xf32, #tpu.memory_space<vmem>>, vector<1x64xf32>
    %18 = vector.broadcast %17 : vector<1x64xf32> to vector<8x64xf32>
    %19 = arith.mulf %16, %18 : vector<8x64xf32>
    %cst_14 = arith.constant dense<0.000000e+00> : vector<8xf32>
    %20 = vector.multi_reduction <add>, %19, %cst_14 [1] : vector<8x64xf32> to vector<8xf32>
    %21 = vector.shape_cast %20 : vector<8xf32> to vector<8x1xf32>
    %22 = arith.mulf %0, %0 : vector<8x32xf32>
    %cst_15 = arith.constant dense<0.000000e+00> : vector<8xf32>
    %23 = vector.multi_reduction <add>, %22, %cst_15 [1] : vector<8x32xf32> to vector<8xf32>
    %24 = vector.shape_cast %23 : vector<8xf32> to vector<8x1xf32>
    %cst_16 = arith.constant 5.000000e-01 : f32
    %25 = vector.broadcast %cst_16 : f32 to vector<8x1xf32>
    %26 = arith.mulf %25, %24 : vector<8x1xf32>
    %27 = arith.addf %26, %21 : vector<8x1xf32>
    %c0_17 = arith.constant 0 : index
    %c0_18 = arith.constant 0 : index
    %28 = memref.load %arg7[%c0_17, %c0_18] : memref<1x1xf32, #tpu.memory_space<smem>>
    %29 = vector.broadcast %28 : f32 to vector<8x1xf32>
    %30 = arith.addf %27, %29 : vector<8x1xf32>
    %c0_19 = arith.constant 0 : index
    %c0_20 = arith.constant 0 : index
    %31 = vector.load %arg8[%c0_19, %c0_20] : memref<8x1xf32, #tpu.memory_space<vmem>>, vector<8x1xf32>
    tpu.vector_store %arg8[%c0_19, %c0_20], %30 {strides = array<i32>} : memref<8x1xf32, #tpu.memory_space<vmem>>, vector<8x1xf32>,
    return
  }
  func.func @transform_0(%arg0: i32) -> (i32, i32) {
    %c0_i32 = arith.constant 0 : i32
    %c0_i32_0 = arith.constant 0 : i32
    return %arg0, %c0_i32 : i32, i32
  }
  func.func @transform_1(%arg0: i32) -> (i32, i32) {
    %c0_i32 = arith.constant 0 : i32
    %c0_i32_0 = arith.constant 0 : i32
    %c0_i32_1 = arith.constant 0 : i32
    return %c0_i32, %c0_i32_0 : i32, i32
  }
  func.func @transform_2(%arg0: i32) -> (i32, i32) {
    %c0_i32 = arith.constant 0 : i32
    %c0_i32_0 = arith.constant 0 : i32
    %c0_i32_1 = arith.constant 0 : i32
    return %c0_i32, %c0_i32_0 : i32, i32
  }
  func.func @transform_3(%arg0: i32) -> (i32, i32) {
    %c0_i32 = arith.constant 0 : i32
    %c0_i32_0 = arith.constant 0 : i32
    %c0_i32_1 = arith.constant 0 : i32
    return %c0_i32, %c0_i32_0 : i32, i32
  }
  func.func @transform_4(%arg0: i32) -> (i32, i32) {
    %c0_i32 = arith.constant 0 : i32
    %c0_i32_0 = arith.constant 0 : i32
    %c0_i32_1 = arith.constant 0 : i32
    return %c0_i32, %c0_i32_0 : i32, i32
  }
  func.func @transform_5(%arg0: i32) -> (i32, i32) {
    %c0_i32 = arith.constant 0 : i32
    %c0_i32_0 = arith.constant 0 : i32
    %c0_i32_1 = arith.constant 0 : i32
    return %c0_i32, %c0_i32_0 : i32, i32
  }
  func.func @transform_6(%arg0: i32) -> (i32, i32) {
    %c0_i32 = arith.constant 0 : i32
    %c0_i32_0 = arith.constant 0 : i32
    %c0_i32_1 = arith.constant 0 : i32
    return %c0_i32, %c0_i32_0 : i32, i32
  }
  func.func @transform_7(%arg0: i32) -> (i32, i32) {
    %c0_i32 = arith.constant 0 : i32
    %c0_i32_0 = arith.constant 0 : i32
    return %arg0, %c0_i32 : i32, i32
  }
}

</mosaic_0001>

<bundles_post_ra>
// kernel: tpu_custom_call.1
= control target key start
LH: loop header
LB: loop body
LE: loop exit
PB: predicated region body
PF: predicated region fallthrough
CT: control target
= control target key end

     0   :  { %13 = vsyncpa [#allocation4], 0  ;;  %s478_s0 = inlined_call_operand.hbm [shape: f32[8,32], index: 0, kind: input, shape index: {}]   ;;  %s479_s1 = inlined_call_operand.hbm [shape: bf16[32,64], index: 1, kind: input, shape index: {}]   ;;  %s480_s2 = inlined_call_operand.vmem [shape: f32[1,64], index: 2, kind: input, shape index: {}]   ;;  %s481_s3 = inlined_call_operand.hbm [shape: bf16[64,64], index: 3, kind: input, shape index: {}]   ;;  %s482_s4 = inlined_call_operand.vmem [shape: f32[1,64], index: 4, kind: input, shape index: {}]   ;;  %s483_s5 = inlined_call_operand.vmem [shape: f32[1,64], index: 5, kind: input, shape index: {}]   ;;  %s484_s6 = inlined_call_operand.<no memory space> [shape: f32[1,1], index: 6, kind: input, shape index: {}]   ;;  %s485_s7 = inlined_call_operand.vmem [shape: f32[8,1], index: 7, kind: output, shape index: {}]  }
   0x1   :  { %14 = vsyncpa [#allocation6], 0  ;;  %s372_s24 = smov [#allocation5]   ;;  %s302_s28 = scalar_lea.hbm %s479_s1, 256 }
   0x2   :  { %s30_s25 = sshll.u32 %s372_s24, 4  ;;  %p303_p0 = scmp.ne.s32.totalorder %s479_s1, %s302_s28  ;;  %s31_s25 = int_to_ptr.vmem [resolvable:$true] %s30_s25 }
   0x3   :  { %p306_p1 = scmp.lt.u32.totalorder %s302_s28, %s479_s1 }
   0x5   :  { %p308_p2 = pnand %p306_p1, %p303_p0 }
   0x7   :  { %311 = shalt.err (!%p308_p2)
}
   0x8   :  { %s312_s10 = scalar_lea.vmem %s31_s25, 256  ;;  %p317_p4 = scmp.lt.s32.totalorder %s31_s25, %s31_s25 }
   0x9   :  { %p313_p3 = scmp.ne.s32.totalorder %s31_s25, %s312_s10  ;;  %p318_p5 = scmp.lt.s32.totalorder %s312_s10, %s312_s10 }
   0xb   :  { %p319_p6 = por %p318_p5, %p317_p4 }
   0xd   :  { %p320_p7 = pnand %p319_p6, %p313_p3 }
   0xf   :  { %323 = shalt.err (!%p320_p7)
}
  0x10   :  { %s373_s11 = smov 64   ;;  %s374_s12 = smov 4  }
  0x11   :  { %36 = dma.hbm_to_vmem [thread:$0]  %s479_s1, 256, %s31_s25, [#allocation6], %s373_s11, %s373_s11, %s374_s12  }
  0x12   :  { %s375_s15 = smov [#allocation3]   ;;  %s376_s17 = smov [#allocation7]  }
  0x13   :  { %s21_s16 = sshll.u32 %s375_s15, 4  ;;  %s44_s18 = sshll.u32 %s376_s17, 4  ;;  %s22_s16 = int_to_ptr.vmem [resolvable:$true] %s21_s16  ;;  %s45_s18 = int_to_ptr.vmem [resolvable:$true] %s44_s18 }
  0x14   :  { %s324_s21 = scalar_lea.hbm %s478_s0, 128 }
  0x15   :  { %p325_p8 = scmp.ne.s32.totalorder %s478_s0, %s324_s21  ;;  %p328_p9 = scmp.lt.u32.totalorder %s324_s21, %s478_s0 }
  0x17   :  { %p330_p10 = pnand %p328_p9, %p325_p8 }
  0x19   :  { %333 = shalt.err (!%p330_p10)
}
  0x1a   :  { %s334_s1 = scalar_lea.vmem %s22_s16, 128  ;;  %p339_p12 = scmp.lt.s32.totalorder %s22_s16, %s22_s16 }
  0x1b   :  { %p335_p11 = scmp.ne.s32.totalorder %s22_s16, %s334_s1  ;;  %p340_p13 = scmp.lt.s32.totalorder %s334_s1, %s334_s1 }
  0x1d   :  { %p341_p0 = por %p340_p13, %p339_p12 }
  0x1f   :  { %p342_p1 = pnand %p341_p0, %p335_p11 }
  0x21   :  { %345 = shalt.err (!%p342_p1)
}
  0x22   :  { %24 = dma.hbm_to_vmem [thread:$0]  %s478_s0, 128, %s22_s16, [#allocation4]  }
  0x23   :  { %s346_s30 = scalar_lea.hbm %s481_s3, 512 }
  0x24   :  { %p347_p2 = scmp.ne.s32.totalorder %s481_s3, %s346_s30  ;;  %p350_p3 = scmp.lt.u32.totalorder %s346_s30, %s481_s3 }
  0x26   :  { %p352_p4 = pnand %p350_p3, %p347_p2 }
  0x28   :  { %355 = shalt.err (!%p352_p4)
}
  0x29   :  { %s356_s14 = scalar_lea.vmem %s45_s18, 512  ;;  %p361_p6 = scmp.lt.s32.totalorder %s45_s18, %s45_s18 }
  0x2a   :  { %p357_p5 = scmp.ne.s32.totalorder %s45_s18, %s356_s14  ;;  %p362_p7 = scmp.lt.s32.totalorder %s356_s14, %s356_s14 }
  0x2c   :  { %p363_p8 = por %p362_p7, %p361_p6 }
  0x2e   :  { %p364_p9 = pnand %p363_p8, %p357_p5 }
  0x30   :  { %367 = shalt.err (!%p364_p9)
}
  0x31   :  { %50 = dma.hbm_to_vmem [thread:$0]  %s481_s3, 512, %s45_s18, [#allocation6], %s373_s11, %s373_s11, %s374_s12  }
  0x32   :  { %368 = dma.done.wait [#allocation4], 128  }
  0x33   :  { %369 = vsyncadd [#allocation4], 4294967168 }
  0x34   :  { %370 = dma.done.wait [#allocation6], 768  }
  0x35   :  { %371 = vsyncadd [#allocation6], 4294966528  ;;  %v377_v0 = vmov 0.0   ;;  %vm378_vm0 = vmmov 0   ;;  %v296_v1 = vld [vmem:[#allocation5] sm:$0xff]   ;;  %v297_v2 = vld [vmem:[#allocation5 + $0x8] sm:$0xff]   ;;  %v240_v31 = vstv %s484_s6 }
  0x36   :  { %269 = vmatprep.subr.bf16.mxu0 %v377_v0  ;;  %273 = vmatprep.mubr.msk.bf16.mxu0 %vm378_vm0, %v377_v0  ;;  %v67_v3 = vld [vmem:[#allocation3] sm:$0xff]  ;;  %v298_v4 = vld [vmem:[#allocation7] sm:$0xff]   ;;  %vm92_vm1 = vcmask 261120   ;;  %v300_v7 = vld [vmem:[#allocation7 + $0x10] sm:$0xff]   ;;  %vm177_vm2 = vcmask 523264   ;;  %vm242_vm3 = vcmask 7168  }
  0x37   :  { %277 = vmatprep.subr.bf16.mxu1 %v377_v0  ;;  %285 = vmatprep.mubr.msk.bf16.mxu1 %vm378_vm0, %v377_v0  ;;  %v299_v5 = vld [vmem:[#allocation7 + $0x8] sm:$0xff]   ;;  %v68_v6 = vpack.c.bf16 %v67_v3, %v67_v3  ;;  %v301_v8 = vld [vmem:[#allocation7 + $0x18] sm:$0xff]   ;;  %v233_v17 = vmul.f32 %v67_v3, %v67_v3 }
  0x38   :  { %270 = vmatpush3.bf16.msra.mxu0 %v296_v1  ;;  %278 = vmatpush3.bf16.msra.mxu1 %v298_v4  ;;  %v250_v9 = vld [vmem:[%s480_s2] ss:$0 sm:$0xff] }
  0x39   :  { %271 = vmatprep.subr.bf16.mxu0 %v377_v0  ;;  %279 = vmatprep.subr.bf16.mxu1 %v377_v0  ;;  %v234_v18 = vsel %vm92_vm1, %v233_v17, 0.0  ;;  %v254_v19 = vld [vmem:[%s482_s4] ss:$0 sm:$0xff] }
  0x3a   :  { %235 = vadd.xlane.f32.xlu0 %v234_v18  ;;  %v260_v24 = vld [vmem:[%s483_s5] ss:$0 sm:$0xff] }
  0x3c   :  { %272 = vmatpush3.bf16.msra.mxu0 %v297_v2  ;;  %280 = vmatpush3.bf16.msra.mxu1 %v299_v5 }
  0x3d   :  { %281 = vmatprep.subr.bf16.mxu1 %v377_v0 }
  0x3f   :  { %274 = vmatmul.mubr.msk.bf16.vlgmr.msra.gmra.mrb[0].mxu0 %vm92_vm1, %v68_v6 }
  0x40   :  { %282 = vmatpush3.bf16.msra.mxu1 %v300_v7 }
  0x41   :  { %283 = vmatprep.subr.bf16.mxu1 %v377_v0 }
  0x44   :  { %284 = vmatpush3.bf16.msra.mxu1 %v301_v8 }
  0xc7   :  { %v236_v29 = vpop.xlane.xlu0 %235 }
  0xc8   :  { %v237_v30 = vmul.f32 0.5, %v236_v29 }
 0x112   :  { %v130_v10 = vpop.f32.mrb[0].mxu0 }
 0x113   :  { %v131_v11 = vadd.f32 %v250_v9, %v130_v10  ;;  %v275_v12 = vpop.f32.mrb[1].mxu0 }
 0x114   :  { %v133_v13 = vpop.f32.mrb[2].mxu0 }
 0x115   :  { %v136_v14 = vmax.f32 %v131_v11, 0.0  ;;  %v276_v15 = vpop.f32.mrb[3].mxu0 }
 0x117   :  { %v137_v16 = vpack.c.bf16 %v136_v14, %v136_v14 }
 0x119   :  { %286 = vmatmul.mubr.msk.bf16.vlgmr.msra.gmra.mrb[0].mxu1 %vm177_vm2, %v137_v16 }
 0x1ec   :  { %v215_v20 = vpop.f32.mrb[0].mxu1 }
 0x1ed   :  { %v216_v21 = vadd.f32 %v254_v19, %v215_v20  ;;  %v287_v22 = vpop.f32.mrb[1].mxu1 }
 0x1ee   :  { %v218_v23 = vpop.f32.mrb[2].mxu1 }
 0x1ef   :  { %v221_v25 = vmax.f32 %v216_v21, 0.0  ;;  %v288_v26 = vpop.f32.mrb[3].mxu1 }
 0x1f1   :  { %v229_v27 = vmul.f32 %v260_v24, %v221_v25 }
 0x1f3   :  { %v230_v28 = vsel %vm177_vm2, %v229_v27, 0.0 }
 0x1f4   :  { %231 = vadd.xlane.f32.xlu0 %v230_v28 }
 0x281   :  { %v232_v32 = vpop.xlane.xlu0 %231 }
 0x282   :  { %v238_v33 = vadd.f32 %v237_v30, %v232_v32 }
 0x284   :  { %v241_v34 = vadd.f32 %v240_v31, %v238_v33 }
 0x286   :  { %243 = vst.msk [vmem:[%s485_s7] sm:$0xff] %vm242_vm3, %v241_v34 }
 0x287   :  { %248 = vsyncpa [#allocation4], 1 }
 0x288   :  { %249 = vsyncpa [#allocation6], 1 }

</bundles_post_ra>
